<compile_context>
chip_gen: v5e
topology: v5e:2x2
jax: 0.10.0
libtpu: 0.0.40
codegen_flags: <defaults>
</compile_context>

<pallas_src>
import functools

import jax
import jax.numpy as jnp
from jax.experimental import pallas as pl
from jax.experimental.pallas import tpu as pltpu


# --------------------------------------------------------------------------
# Fused kernel: conv (im2col matmul) + bias + ReLU + pooled-sum accumulation
# + (on the last row tile of each batch) global-average finalize + FC head.
#
#   p_ref : (TM, K)      bf16   im2col patches for this row tile
#   wc_ref: (K, CPAD)    bf16   conv weights (Cout zero-padded to 128 lanes)
#   bc_ref: (1, CPAD)    f32    conv bias (padded)
#   wf_ref: (CPAD, LPAD) f32    FC weights (padded)
#   bf_ref: (1, LPAD)    f32    FC bias (padded)
#   o_ref : (1, 8, LPAD) f32    per-batch output block (lane-dense)
#   acc   : (1, CPAD)    f32    VMEM scratch: running pooled sum for batch b
# --------------------------------------------------------------------------
def _fused_conv_pool_fc_kernel(p_ref, wc_ref, bc_ref, wf_ref, bf_ref,
                               o_ref, acc_ref, *, inv_hw):
    t = pl.program_id(1)

    @pl.when(t == 0)
    def _init():
        acc_ref[...] = jnp.zeros_like(acc_ref)

    # Conv expressed as an MXU matmul: bf16 inputs, f32 accumulation.
    feat = jnp.dot(p_ref[...], wc_ref[...],
                   preferred_element_type=jnp.float32)            # (TM, CPAD)
    feat = jnp.maximum(feat + bc_ref[...], 0.0)

    # Running pooled sum (padded channels contribute exactly 0).
    acc_ref[...] += jnp.sum(feat, axis=0, keepdims=True)          # (1, CPAD)

    @pl.when(t == pl.num_programs(1) - 1)
    def _finalize():
        pooled = acc_ref[...] * inv_hw                            # (1, CPAD)
        out = jnp.dot(pooled, wf_ref[...],
                      preferred_element_type=jnp.float32) + bf_ref[...]
        o_ref[...] = jnp.broadcast_to(out, o_ref.shape).astype(o_ref.dtype)


# --------------------------------------------------------------------------
# Full forward: frozen conv stem -> global avg pool -> Linear(latent_dim)
# --------------------------------------------------------------------------
@functools.partial(jax.jit, static_argnames=("tm",))
def pretrained_conv_forward(x_nchw, params, *, tm=512):
    B, C, H, W = x_nchw.shape
    w_conv = params["w_conv"]            # (Cout, Cin, 3, 3)  (PyTorch layout)
    b_conv = params["b_conv"]            # (Cout,)
    w_fc = params["w_fc"]                # (latent, Cout)     (PyTorch Linear)
    b_fc = params["b_fc"]                # (latent,)
    Cout = w_conv.shape[0]
    latent = w_fc.shape[0]

    HW = H * W
    K = 9 * C
    CPAD = pl.cdiv(Cout, 128) * 128      # lane-dense conv output / pooled acc
    LPAD = pl.cdiv(latent, 128) * 128    # lane-dense FC output

    tm = min(tm, HW)
    # TODO(synk): handle ragged tails (HW % tm != 0) with a masked last tile
    # before scaling to arbitrary image sizes.
    assert HW % tm == 0 and tm % 8 == 0, (HW, tm)
    nt = HW // tm

    # ---- glue: NCHW -> NHWC, pad, im2col in bf16 (halves patch HBM bytes) --
    x = jnp.transpose(x_nchw, (0, 2, 3, 1)).astype(jnp.bfloat16)
    xp = jnp.pad(x, ((0, 0), (1, 1), (1, 1), (0, 0)))
    patches = jnp.concatenate(
        [xp[:, dy:dy + H, dx:dx + W, :] for dy in range(3) for dx in range(3)],
        axis=-1,
    ).reshape(B * HW, K)                                          # (M, K) bf16

    # conv weight (Cout,Cin,kh,kw) -> (kh,kw,Cin,Cout) -> (K, CPAD), bf16
    wc = jnp.transpose(w_conv, (2, 3, 1, 0)).reshape(K, Cout)
    wc = jnp.pad(wc, ((0, 0), (0, CPAD - Cout))).astype(jnp.bfloat16)
    bc = jnp.pad(b_conv, (0, CPAD - Cout)).reshape(1, CPAD).astype(jnp.float32)

    # FC head: (latent, Cout) -> (CPAD, LPAD); kept f32 (tiny, accuracy).
    wf = jnp.pad(jnp.transpose(w_fc, (1, 0)),
                 ((0, CPAD - Cout), (0, LPAD - latent))).astype(jnp.float32)
    bf = jnp.pad(b_fc, (0, LPAD - latent)).reshape(1, LPAD).astype(jnp.float32)

    kernel = functools.partial(_fused_conv_pool_fc_kernel, inv_hw=1.0 / HW)

    out_padded = pl.pallas_call(
        kernel,
        out_shape=jax.ShapeDtypeStruct((B, 8, LPAD), jnp.float32),
        grid=(B, nt),
        in_specs=[
            pl.BlockSpec((tm, K), lambda b, t: (b * nt + t, 0)),   # patches
            pl.BlockSpec((K, CPAD), lambda b, t: (0, 0)),          # conv W
            pl.BlockSpec((1, CPAD), lambda b, t: (0, 0)),          # conv b
            pl.BlockSpec((CPAD, LPAD), lambda b, t: (0, 0)),       # fc W
            pl.BlockSpec((1, LPAD), lambda b, t: (0, 0)),          # fc b
        ],
        out_specs=pl.BlockSpec((1, 8, LPAD), lambda b, t: (b, 0, 0)),
        scratch_shapes=[pltpu.VMEM((1, CPAD), jnp.float32)],
        compiler_params=pltpu.CompilerParams(
            dimension_semantics=("parallel", "arbitrary"),
            vmem_limit_bytes=32 * 1024 * 1024),
    )(patches, wc, bc, wf, bf)

    # Drop the sublane replication and the lane padding.
    return out_padded[:, 0, :latent]


if __name__ == "__main__":
    # Small shapes consistent with the module's forward:
    #   image input NCHW (B=2, C=3, H=W=16), stem features F=64, latent_dim=32.
    B, C_IN, H, W = 2, 3, 16, 16
    C_FEAT = 64
    LATENT_DIM = 32

    key = jax.random.PRNGKey(0)
    k_x, k_wc, k_bc, k_wf, k_bf = jax.random.split(key, 5)

    x = jax.random.normal(k_x, (B, C_IN, H, W), dtype=jnp.float32)

    params = {
        # conv stem weights, PyTorch layout (Cout, Cin, kh, kw)
        "w_conv": 0.1 * jax.random.normal(k_wc, (C_FEAT, C_IN, 3, 3), jnp.float32),
        "b_conv": 0.1 * jax.random.normal(k_bc, (C_FEAT,), jnp.float32),
        # replaced classifier: nn.Linear(in_features=C_FEAT, latent_dim)
        "w_fc": 0.1 * jax.random.normal(k_wf, (LATENT_DIM, C_FEAT), jnp.float32),
        "b_fc": 0.1 * jax.random.normal(k_bf, (LATENT_DIM,), jnp.float32),
    }

    out = pretrained_conv_forward(x, params)
    out = jax.block_until_ready(out)
    assert out.shape == (B, LATENT_DIM), out.shape

    # Pure-JAX f32 reference of the same math (kernel uses bf16 conv inputs,
    # hence the slightly loosened tolerance).
    xh = jnp.transpose(x, (0, 2, 3, 1))
    ref_feat = jax.lax.conv_general_dilated(
        xh, jnp.transpose(params["w_conv"], (2, 3, 1, 0)),
        window_strides=(1, 1), padding="SAME",
        dimension_numbers=("NHWC", "HWIO", "NHWC"))
    ref_feat = jnp.maximum(ref_feat + params["b_conv"], 0.0)
    ref_pool = jnp.mean(ref_feat, axis=(1, 2))
    ref_out = ref_pool @ params["w_fc"].T + params["b_fc"]
    max_err = float(jnp.max(jnp.abs(out - ref_out)))
    assert jnp.allclose(out, ref_out, atol=3e-2, rtol=3e-2), max_err

    print("KERNEL_OK")
</pallas_src>

<mosaic_0001>
module attributes {stable_mosaic.version = 11 : i64} {
  func.func @_fused_conv_pool_fc_kernel(%arg0: i32, %arg1: i32, %arg2: memref<256x27xbf16, #tpu.memory_space<vmem>>, %arg3: memref<27x128xbf16, #tpu.memory_space<vmem>>, %arg4: memref<1x128xf32, #tpu.memory_space<vmem>>, %arg5: memref<128x128xf32, #tpu.memory_space<vmem>>, %arg6: memref<1x128xf32, #tpu.memory_space<vmem>>, %arg7: memref<1x8x128xf32, #tpu.memory_space<vmem>>, %arg8: memref<1x128xf32, #tpu.memory_space<vmem>>) attributes {dimension_semantics = [#tpu.dimension_semantics<parallel>, #tpu.dimension_semantics<arbitrary>], iteration_bounds = array<i64: 2, 1>, scalar_prefetch = 0 : i64, scratch_operands = 1 : i64, tpu.core_type = #tpu.core_type<tc>, window_params = [{transform_indices = @transform_0, window_bounds = array<i64: 256, 27>}, {pipeline_mode = #tpu.pipeline_mode<synchronous>, transform_indices = @transform_1, window_bounds = array<i64: 27, 128>}, {pipeline_mode = #tpu.pipeline_mode<synchronous>, transform_indices = @transform_2, window_bounds = array<i64: 1, 128>}, {pipeline_mode = #tpu.pipeline_mode<synchronous>, transform_indices = @transform_3, window_bounds = array<i64: 128, 128>}, {pipeline_mode = #tpu.pipeline_mode<synchronous>, transform_indices = @transform_4, window_bounds = array<i64: 1, 128>}, {transform_indices = @transform_5, window_bounds = array<i64: 1, 8, 128>}]} {
    %c0_i32 = arith.constant 0 : i32
    %0 = arith.cmpi eq, %arg1, %c0_i32 : i32
    %1 = arith.extui %0 : i1 to i32
    %c0_i32_0 = arith.constant 0 : i32
    %2 = arith.cmpi ne, %1, %c0_i32_0 : i32
    scf.if %2 {
      %cst_14 = arith.constant 0.000000e+00 : f32
      %19 = vector.broadcast %cst_14 : f32 to vector<1x128xf32>
      %c0_15 = arith.constant 0 : index
      %c0_16 = arith.constant 0 : index
      %20 = vector.load %arg8[%c0_15, %c0_16] : memref<1x128xf32, #tpu.memory_space<vmem>>, vector<1x128xf32>
      tpu.vector_store %arg8[%c0_15, %c0_16], %19 {strides = array<i32>} : memref<1x128xf32, #tpu.memory_space<vmem>>, vector<1x128xf32>,
    } else {
    }
    %c0 = arith.constant 0 : index
    %c0_1 = arith.constant 0 : index
    %3 = vector.load %arg2[%c0, %c0_1] : memref<256x27xbf16, #tpu.memory_space<vmem>>, vector<256x27xbf16>
    %c0_2 = arith.constant 0 : index
    %c0_3 = arith.constant 0 : index
    %4 = vector.load %arg3[%c0_2, %c0_3] : memref<27x128xbf16, #tpu.memory_space<vmem>>, vector<27x128xbf16>
    %cst = arith.constant dense<0.000000e+00> : vector<256x128xf32>
    %5 = tpu.matmul %3, %4, %cst {dimension_numbers = #tpu.dot_dimension_numbers<[1], [0], [0], [1], [0, 0, 1, 1], [], []>} : vector<256x27xbf16>, vector<27x128xbf16>, vector<256x128xf32> -> vector<256x128xf32>
    %c0_4 = arith.constant 0 : index
    %c0_5 = arith.constant 0 : index
    %6 = vector.load %arg4[%c0_4, %c0_5] : memref<1x128xf32, #tpu.memory_space<vmem>>, vector<1x128xf32>
    %7 = vector.broadcast %6 : vector<1x128xf32> to vector<256x128xf32>
    %8 = arith.addf %5, %7 : vector<256x128xf32>
    %cst_6 = arith.constant 0.000000e+00 : f32
    %9 = vector.broadcast %cst_6 : f32 to vector<256x128xf32>
    %10 = arith.maximumf %8, %9 : vector<256x128xf32>
    %c0_7 = arith.constant 0 : index
    %c0_8 = arith.constant 0 : index
    %11 = vector.load %arg8[%c0_7, %c0_8] : memref<1x128xf32, #tpu.memory_space<vmem>>, vector<1x128xf32>
    %cst_9 = arith.constant dense<0.000000e+00> : vector<128xf32>
    %12 = vector.multi_reduction <add>, %10, %cst_9 [0] : vector<256x128xf32> to vector<128xf32>
    %13 = vector.shape_cast %12 : vector<128xf32> to vector<1x128xf32>
    %14 = arith.addf %11, %13 : vector<1x128xf32>
    %c0_10 = arith.constant 0 : index
    %c0_11 = arith.constant 0 : index
    %15 = vector.load %arg8[%c0_10, %c0_11] : memref<1x128xf32, #tpu.memory_space<vmem>>, vector<1x128xf32>
    tpu.vector_store %arg8[%c0_10, %c0_11], %14 {strides = array<i32>} : memref<1x128xf32, #tpu.memory_space<vmem>>, vector<1x128xf32>,
    %c0_i32_12 = arith.constant 0 : i32
    %16 = arith.cmpi eq, %arg1, %c0_i32_12 : i32
    %17 = arith.extui %16 : i1 to i32
    %c0_i32_13 = arith.constant 0 : i32
    %18 = arith.cmpi ne, %17, %c0_i32_13 : i32
    scf.if %18 {
      %c0_14 = arith.constant 0 : index
      %c0_15 = arith.constant 0 : index
      %19 = vector.load %arg8[%c0_14, %c0_15] : memref<1x128xf32, #tpu.memory_space<vmem>>, vector<1x128xf32>
      %cst_16 = arith.constant 3.906250e-03 : f32
      %20 = vector.broadcast %cst_16 : f32 to vector<1x128xf32>
      %21 = arith.mulf %19, %20 : vector<1x128xf32>
      %c0_17 = arith.constant 0 : index
      %c0_18 = arith.constant 0 : index
      %22 = vector.load %arg5[%c0_17, %c0_18] : memref<128x128xf32, #tpu.memory_space<vmem>>, vector<128x128xf32>
      %cst_19 = arith.constant dense<0.000000e+00> : vector<1x128xf32>
      %23 = tpu.matmul %21, %22, %cst_19 {dimension_numbers = #tpu.dot_dimension_numbers<[1], [0], [0], [1], [0, 0, 1, 1], [], []>} : vector<1x128xf32>, vector<128x128xf32>, vector<1x128xf32> -> vector<1x128xf32>
      %c0_20 = arith.constant 0 : index
      %c0_21 = arith.constant 0 : index
      %24 = vector.load %arg6[%c0_20, %c0_21] : memref<1x128xf32, #tpu.memory_space<vmem>>, vector<1x128xf32>
      %25 = arith.addf %23, %24 : vector<1x128xf32>
      %26 = vector.shape_cast %25 : vector<1x128xf32> to vector<1x1x128xf32>
      %27 = vector.broadcast %26 : vector<1x1x128xf32> to vector<1x8x128xf32>
      %c0_22 = arith.constant 0 : index
      %c0_23 = arith.constant 0 : index
      %c0_24 = arith.constant 0 : index
      %28 = vector.load %arg7[%c0_22, %c0_23, %c0_24] : memref<1x8x128xf32, #tpu.memory_space<vmem>>, vector<1x8x128xf32>
      tpu.vector_store %arg7[%c0_22, %c0_23, %c0_24], %27 {strides = array<i32>} : memref<1x8x128xf32, #tpu.memory_space<vmem>>, vector<1x8x128xf32>,
    } else {
    }
    return
  }
  func.func @transform_0(%arg0: i32, %arg1: i32) -> (i32, i32) {
    %c1_i32 = arith.constant 1 : i32
    %0 = arith.muli %arg0, %c1_i32 : i32
    %1 = arith.addi %0, %arg1 : i32
    %c0_i32 = arith.constant 0 : i32
    %c0_i32_0 = arith.constant 0 : i32
    return %1, %c0_i32 : i32, i32
  }
  func.func @transform_1(%arg0: i32, %arg1: i32) -> (i32, i32) {
    %c0_i32 = arith.constant 0 : i32
    %c0_i32_0 = arith.constant 0 : i32
    %c0_i32_1 = arith.constant 0 : i32
    return %c0_i32, %c0_i32_0 : i32, i32
  }
  func.func @transform_2(%arg0: i32, %arg1: i32) -> (i32, i32) {
    %c0_i32 = arith.constant 0 : i32
    %c0_i32_0 = arith.constant 0 : i32
    %c0_i32_1 = arith.constant 0 : i32
    return %c0_i32, %c0_i32_0 : i32, i32
  }
  func.func @transform_3(%arg0: i32, %arg1: i32) -> (i32, i32) {
    %c0_i32 = arith.constant 0 : i32
    %c0_i32_0 = arith.constant 0 : i32
    %c0_i32_1 = arith.constant 0 : i32
    return %c0_i32, %c0_i32_0 : i32, i32
  }
  func.func @transform_4(%arg0: i32, %arg1: i32) -> (i32, i32) {
    %c0_i32 = arith.constant 0 : i32
    %c0_i32_0 = arith.constant 0 : i32
    %c0_i32_1 = arith.constant 0 : i32
    return %c0_i32, %c0_i32_0 : i32, i32
  }
  func.func @transform_5(%arg0: i32, %arg1: i32) -> (i32, i32, i32) {
    %c0_i32 = arith.constant 0 : i32
    %c0_i32_0 = arith.constant 0 : i32
    %c0_i32_1 = arith.constant 0 : i32
    return %arg0, %c0_i32, %c0_i32_0 : i32, i32, i32
  }
}

</mosaic_0001>

<bundles_post_ra>
// kernel: pretrained_conv_forward.1
= control target key start
LH: loop header
LB: loop body
LE: loop exit
PB: predicated region body
PF: predicated region fallthrough
CT: control target
= control target key end

     0   :  { %s908_s18 = smov 0   ;;  %s910_s19 = smov 0   ;;  %s1107_s0 = inlined_call_operand.vmem [shape: bf16[512,27], index: 0, kind: input, shape index: {}]   ;;  %s1108_s1 = inlined_call_operand.vmem [shape: bf16[27,128], index: 1, kind: input, shape index: {}]   ;;  %s1109_s2 = inlined_call_operand.vmem [shape: f32[1,128], index: 2, kind: input, shape index: {}]   ;;  %s1110_s3 = inlined_call_operand.vmem [shape: f32[128,128], index: 3, kind: input, shape index: {}]   ;;  %s1111_s4 = inlined_call_operand.vmem [shape: f32[1,128], index: 4, kind: input, shape index: {}]   ;;  %s1112_s5 = inlined_call_operand.vmem [shape: f32[2,8,128], index: 5, kind: output, shape index: {}]  }
   0x1   :  { %s912_s20 = smov 0  }
   0x2 LB: > { %s27_s21 = sadd.s32 1, %s870_s19  ;;  %p707_p0 = scmp.ge.s32.totalorder %s874_s20, 1  ;;  %s874_s20 = sphi %s912_s20, %s15_s20   ;;  %s870_s19 = sphi %s910_s19, %s1114_s19   ;;  %s866_s18 = sphi %s908_s18, %s1113_s18  }
   0x3   : > { %p29_p1 = scmp.ge.s32.totalorder %s27_s21, 2  ;;  %p204_p2 = scmp.lt.s32.totalorder %s874_s20, 3 }
   0x5   : > { %s1116_s21 = smov (%p29_p1, %s27_s21), 0  ;;  %p205_p3 = pnand %p707_p0, %p204_p2 }
   0x6   : > { %s708_s26 = sshll.u32 (!%p205_p3), %s866_s18, 5  ;;  %p240_p5 = scmp.lt.s32.totalorder (!%p205_p3), %s866_s18, 1 }
   0x7   : > { %208 = sbr.rel (%p205_p3) target bundleno = 428 (0x1ac), region = 40  ;;  %p234_p4 = scmp.lt.s32.totalorder (!%p205_p3), %s708_s26, 63 }
   0xc   : > { %v781_v0 = vld [vmem:[%s1108_s1 + $0x8] sm:$0xf]  ;;  %v818_v1 = vld [vmem:[%s1108_s1 + $0x8] sm:$0x30]  ;;  %vm430_vm0 = vcmask 1044480   ;;  %vm431_vm1 = vcmask 1045504  }
   0xd   : > { %v782_v2 = vor.u32 %v818_v1, %v781_v0  ;;  %v876_v3 = vmov 65535   ;;  %s1118_s26 = smov (!%p234_p4, %s708_s26), 63  ;;  %v817_v7 = vld [vmem:[%s1108_s1] sm:$0xff]  ;;  %vm381_vm2 = vcmask 220160   ;;  %s1120_s18 = smov (!%p240_p5, %s866_s18), 1 }
   0xe   : > { %v432_v4 = vsel %vm430_vm0, 4294967295, %v876_v3  ;;  %s709_s29 = sshll.u32 %s1118_s26, 2  ;;  %v988_v38 = vld [vmem:[%s1109_s2] ss:$0 sm:$0xff]  ;;  %s710_s27 = sshll.u32 %s1120_s18, 3 }
   0xf   : > { %v433_v5 = vsel %vm431_vm1, %v432_v4, 0  ;;  %s941_s7 = scalar_lea.vmem %s1107_s0, %s709_s29  ;;  %s243_s30 = scalar_lea.vmem %s1112_s5, %s710_s27 }
  0x10   : > { %v435_v6 = vand.u32 %v782_v2, %v433_v5  ;;  %v801_v8 = vld [vmem:[%s941_s7] sm:$0xff]  ;;  %v808_v9 = vld [vmem:[%s941_s7 + $0x38] sm:$0xff]  ;;  %v802_v11 = vld [vmem:[%s941_s7 + $0x8] sm:$0xff] }
  0x11   : > { %v813_v10 = vld [vmem:[%s941_s7 + $0x60] sm:$0xff]  ;;  %v806_v13 = vld [vmem:[%s941_s7 + $0x28] sm:$0xff]  ;;  %v803_v15 = vld [vmem:[%s941_s7 + $0x10] sm:$0xff] }
  0x12   : > { %443 = vmatpush.bf16.msra.mxu0 %v435_v6  ;;  %820 = vmatpush.bf16.msra.mxu2 %v435_v6  ;;  %v809_v12 = vld [vmem:[%s941_s7 + $0x40] sm:$0xff]  ;;  %v814_v14 = vld [vmem:[%s941_s7 + $0x68] sm:$0xff]  ;;  %v807_v17 = vld [vmem:[%s941_s7 + $0x30] sm:$0xff] }
  0x13   : > { %821 = vmatpush.bf16.msra.mxu3 %v435_v6  ;;  %819 = vmatpush.bf16.msra.mxu1 %v435_v6  ;;  %v810_v16 = vld [vmem:[%s941_s7 + $0x48] sm:$0xff]  ;;  %v815_v18 = vld [vmem:[%s941_s7 + $0x70] sm:$0xff]  ;;  %v804_v19 = vld [vmem:[%s941_s7 + $0x18] sm:$0xff] }
  0x14   : > { %v811_v20 = vld [vmem:[%s941_s7 + $0x50] sm:$0xff]  ;;  %v816_v21 = vld [vmem:[%s941_s7 + $0x78] sm:$0xff]  ;;  %v805_v22 = vld [vmem:[%s941_s7 + $0x20] sm:$0xff] }
  0x15   : > { %v812_v23 = vld [vmem:[%s941_s7 + $0x58] sm:$0xff] }
  0x16   : > { %444 = vmatpush.bf16.msra.mxu0 %v817_v7  ;;  %823 = vmatpush.bf16.msra.mxu2 %v817_v7 }
  0x17   : > { %824 = vmatpush.bf16.msra.mxu3 %v817_v7  ;;  %822 = vmatpush.bf16.msra.mxu1 %v817_v7 }
  0x19   : > { %783 = vmatmul.msk.bf16.vlgmr.msra.gmra.mxu0 %vm381_vm2, %v801_v8  ;;  %790 = vmatmul.msk.bf16.vlgmr.msra.gmra.mxu2 %vm381_vm2, %v808_v9 }
  0x1a   : > { %795 = vmatmul.msk.bf16.vlgmr.msra.gmra.mxu3 %vm381_vm2, %v813_v10  ;;  %788 = vmatmul.msk.bf16.vlgmr.msra.gmra.mxu1 %vm381_vm2, %v806_v13 }
  0x29   : > { %784 = vmatmul.msk.bf16.gmra.mxu0 %vm381_vm2, %v802_v11  ;;  %791 = vmatmul.msk.bf16.gmra.mxu2 %vm381_vm2, %v809_v12 }
  0x2a   : > { %796 = vmatmul.msk.bf16.gmra.mxu3 %vm381_vm2, %v814_v14  ;;  %789 = vmatmul.msk.bf16.gmra.mxu1 %vm381_vm2, %v807_v17 }
  0x39   : > { %785 = vmatmul.msk.bf16.gmra.mxu0 %vm381_vm2, %v803_v15  ;;  %792 = vmatmul.msk.bf16.gmra.mxu2 %vm381_vm2, %v810_v16 }
  0x3a   : > { %797 = vmatmul.msk.bf16.gmra.mxu3 %vm381_vm2, %v815_v18 }
  0x49   : > { %786 = vmatmul.msk.bf16.gmra.mxu0 %vm381_vm2, %v804_v19  ;;  %793 = vmatmul.msk.bf16.gmra.mxu2 %vm381_vm2, %v811_v20 }
  0x4a   : > { %798 = vmatmul.msk.bf16.gmra.mxu3 %vm381_vm2, %v816_v21 }
  0x59   : > { %787 = vmatmul.msk.bf16.gmra.mxu0 %vm381_vm2, %v805_v22  ;;  %794 = vmatmul.msk.bf16.gmra.mxu2 %vm381_vm2, %v812_v23 }
  0x96   : > { %v446_v24 = vpop.f32.mrf.mxu0 }
  0x97   : > { %v471_v35 = vpop.f32.mrf.mxu1  ;;  %v447_v41 = vadd.f32 %v988_v38, %v446_v24 }
  0x98   : > { %v472_v9 = vadd.f32 %v988_v38, %v471_v35  ;;  %v618_v35 = vld [vmem:[%s1110_s3 + $0x78] sm:$0xff] }
  0x99   : > { %v526_v48 = vmax.f32 %v447_v41, 0.0  ;;  %620 = vmatpush.msrb.mxu1 %v618_v35  ;;  %v603_v35 = vld [vmem:[%s1110_s3] sm:$0xff] }
  0x9a   : > { %v536_v17 = vmax.f32 %v472_v9, 0.0 }
  0x9c   : > { %v481_v25 = vpop.f32.mrf.mxu2 }
  0x9d   : > { %v981_v34 = vpop.f32.mrf.mxu3  ;;  %v482_v23 = vadd.f32 %v988_v38, %v481_v25  ;;  %v617_v25 = vld [vmem:[%s1110_s3 + $0x70] sm:$0xff] }
  0x9e   : > { %v448_v26 = vpop.f32.mrf.mxu0  ;;  %621 = vmatpush.msrb.mxu1 %v617_v25 }
  0x9f   : > { %v449_v40 = vadd.f32 %v988_v38, %v448_v26  ;;  %v473_v43 = vpop.f32.mrf.mxu1 }
  0xa0   : > { %v474_v12 = vadd.f32 %v988_v38, %v473_v43 }
  0xa1   : > { %v527_v46 = vmax.f32 %v449_v40, 0.0 }
  0xa2   : > { %v537_v20 = vmax.f32 %v474_v12, 0.0 }
  0xa3   : > { %v559_v51 = vadd.f32 %v527_v46, %v526_v48  ;;  %v616_v46 = vld [vmem:[%s1110_s3 + $0x68] sm:$0xff] }
  0xa4   : > { %v975_v28 = vpop.f32.mrf.mxu2  ;;  %622 = vmatpush.msrb.mxu1 %v616_v46 }
  0xa5   : > { %v990_v39 = vpop.f32.mrf.mxu3 }
  0xa6   : > { %v451_v27 = vpop.f32.mrf.mxu0 }
  0xa7   : > { %v452_v42 = vadd.f32 %v988_v38, %v451_v27  ;;  %v476_v62 = vpop.f32.mrf.mxu1 }
  0xa8   : > { %v477_v18 = vadd.f32 %v988_v38, %v476_v62 }
  0xa9   : > { %v528_v49 = vmax.f32 %v452_v42, 0.0 }
  0xaa   : > { %v538_v24 = vmax.f32 %v477_v18, 0.0 }
  0xab   : > { %v560_v55 = vadd.f32 %v559_v51, %v528_v49 }
  0xac   : > { %v977_v30 = vpop.f32.mrf.mxu2 }
  0xad   : > { %v1000_v54 = vpop.f32.mrf.mxu3  ;;  %v487_v40 = vadd.f32 %v988_v38, %v977_v30 }
  0xae   : > { %v453_v29 = vpop.f32.mrf.mxu0 }
  0xaf   : > { %v454_v47 = vadd.f32 %v988_v38, %v453_v29  ;;  %v478_v15 = vpop.f32.mrf.mxu1  ;;  %v484_v29 = vadd.f32 %v988_v38, %v975_v28  ;;  %v542_v30 = vmax.f32 %v487_v40, 0.0 }
  0xb0   : > { %v479_v22 = vadd.f32 %v988_v38, %v478_v15 }
  0xb1   : > { %v529_v52 = vmax.f32 %v454_v47, 0.0  ;;  %v541_v43 = vmax.f32 %v484_v29, 0.0  ;;  %v877_v47 = vmov 0.0   ;;  %v604_v29 = vld [vmem:[%s1110_s3 + $0x8] sm:$0xff] }
  0xb2   : > { %249 = vst [vmem:[#allocation2] sm:$0x1] %v877_v47 }
  0xb3   : > { %v561_v59 = vadd.f32 %v560_v55, %v529_v52 }
  0xb4   : > { %v979_v32 = vpop.f32.mrf.mxu2 }
  0xb5   : > { %v1005_v8 = vpop.f32.mrf.mxu3  ;;  %v489_v28 = vadd.f32 %v988_v38, %v979_v32 }
  0xb6   : > { %v456_v31 = vpop.f32.mrf.mxu0 }
  0xb7   : > { %v457_v50 = vadd.f32 %v988_v38, %v456_v31  ;;  %v539_v31 = vmax.f32 %v479_v22, 0.0  ;;  %v543_v51 = vmax.f32 %v489_v28, 0.0 }
  0xb9   : > { %v530_v56 = vmax.f32 %v457_v50, 0.0  ;;  %v615_v50 = vld [vmem:[%s1110_s3 + $0x60] sm:$0xff] }
  0xba   : > { %623 = vmatpush.msrb.mxu1 %v615_v50 }
  0xbb   : > { %v562_v0 = vadd.f32 %v561_v59, %v530_v56 }
  0xbc   : > { %v983_v36 = vpop.f32.mrf.mxu2 }
  0xbd   : > { %v1013_v27 = vpop.f32.mrf.mxu3  ;;  %v492_v48 = vadd.f32 %v988_v38, %v983_v36 }
  0xbe   : > { %v458_v33 = vpop.f32.mrf.mxu0 }
  0xbf   : > { %v459_v53 = vadd.f32 %v988_v38, %v458_v33  ;;  %v544_v56 = vmax.f32 %v492_v48, 0.0 }
  0xc1   : > { %v531_v60 = vmax.f32 %v459_v53, 0.0  ;;  %v614_v53 = vld [vmem:[%s1110_s3 + $0x58] sm:$0xff] }
  0xc2   : > { %624 = vmatpush.msrb.mxu1 %v614_v53 }
  0xc3   : > { %v563_v3 = vadd.f32 %v562_v0, %v531_v60 }
  0xc4   : > { %v995_v45 = vpop.f32.mrf.mxu2 }
  0xc5   : > { %v494_v32 = vadd.f32 %v988_v38, %v995_v45  ;;  %v518_v55 = vpop.f32.mrf.mxu3 }
  0xc6   : > { %v461_v37 = vpop.f32.mrf.mxu0 }
  0xc7   : > { %v462_v57 = vadd.f32 %v988_v38, %v461_v37  ;;  %v540_v37 = vmax.f32 %v482_v23, 0.0  ;;  %v545_v59 = vmax.f32 %v494_v32, 0.0  ;;  %v605_v23 = vld [vmem:[%s1110_s3 + $0x10] sm:$0xff] }
  0xc9   : > { %v532_v1 = vmax.f32 %v462_v57, 0.0 }
  0xcb   : > { %v564_v5 = vadd.f32 %v563_v3, %v532_v1 }
  0xcc   : > { %v496_v63 = vpop.f32.mrf.mxu2 }
  0xcd   : > { %v497_v36 = vadd.f32 %v988_v38, %v496_v63  ;;  %v521_v12 = vpop.f32.mrf.mxu3 }
  0xce   : > { %v463_v44 = vpop.f32.mrf.mxu0 }
  0xcf   : > { %v464_v61 = vadd.f32 %v988_v38, %v463_v44  ;;  %v546_v0 = vmax.f32 %v497_v36, 0.0 }
  0xd1   : > { %v533_v4 = vmax.f32 %v464_v61, 0.0  ;;  %v612_v61 = vld [vmem:[%s1110_s3 + $0x48] sm:$0xff] }
  0xd3   : > { %v565_v10 = vadd.f32 %v564_v5, %v533_v4 }
  0xd4   : > { %v498_v16 = vpop.f32.mrf.mxu2 }
  0xd5   : > { %v499_v60 = vadd.f32 %v988_v38, %v498_v16  ;;  %v608_v16 = vld [vmem:[%s1110_s3 + $0x28] sm:$0xff] }
  0xd6   : > { %v466_v58 = vpop.f32.mrf.mxu0 }
  0xd7   : > { %v467_v2 = vadd.f32 %v988_v38, %v466_v58  ;;  %v613_v58 = vld [vmem:[%s1110_s3 + $0x50] sm:$0xff]  ;;  %v547_v3 = vmax.f32 %v499_v60, 0.0 }
  0xd8   : > { %625 = vmatpush.msrb.mxu1 %v613_v58 }
  0xd9   : > { %v534_v6 = vmax.f32 %v467_v2, 0.0  ;;  %v611_v2 = vld [vmem:[%s1110_s3 + $0x40] sm:$0xff] }
  0xda   : > { %626 = vmatpush.msrb.mxu1 %v612_v61 }
  0xdb   : > { %v566_v13 = vadd.f32 %v565_v10, %v534_v6  ;;  %v610_v6 = vld [vmem:[%s1110_s3 + $0x38] sm:$0xff] }
  0xdc   : > { %v501_v42 = vpop.f32.mrf.mxu2  ;;  %627 = vmatpush.msrb.mxu1 %v611_v2 }
  0xdd   : > { %v502_v63 = vadd.f32 %v988_v38, %v501_v42 }
  0xde   : > { %v468_v7 = vpop.f32.mrf.mxu0  ;;  %628 = vmatpush.msrb.mxu1 %v610_v6 }
  0xdf   : > { %v469_v11 = vadd.f32 %v988_v38, %v468_v7  ;;  %v507_v7 = vadd.f32 %v988_v38, %v981_v34  ;;  %v548_v10 = vmax.f32 %v502_v63, 0.0  ;;  %v512_v34 = vadd.f32 %v988_v38, %v1000_v54 }
  0xe1   : > { %v535_v14 = vmax.f32 %v469_v11, 0.0  ;;  %v609_v11 = vld [vmem:[%s1110_s3 + $0x30] sm:$0xff]  ;;  %v552_v54 = vmax.f32 %v512_v34, 0.0 }
  0xe2   : > { %629 = vmatpush.msrb.mxu1 %v609_v11 }
  0xe3   : > { %v567_v19 = vadd.f32 %v566_v13, %v535_v14  ;;  %v509_v13 = vadd.f32 %v988_v38, %v990_v39  ;;  %v606_v39 = vld [vmem:[%s1110_s3 + $0x18] sm:$0xff] }
  0xe4   : > { %v503_v62 = vpop.f32.mrf.mxu2  ;;  %630 = vmatpush.msrb.mxu1 %v608_v16 }
  0xe5   : > { %v568_v21 = vadd.f32 %v567_v19, %v536_v17  ;;  %v504_v5 = vadd.f32 %v988_v38, %v503_v62  ;;  %v550_v17 = vmax.f32 %v507_v7, 0.0  ;;  %v607_v19 = vld [vmem:[%s1110_s3 + $0x20] sm:$0xff] }
  0xe6   : > { %631 = vmatpush.msrb.mxu1 %v607_v19 }
  0xe7   : > { %v569_v26 = vadd.f32 %v568_v21, %v537_v20  ;;  %v549_v15 = vmax.f32 %v504_v5, 0.0  ;;  %v551_v20 = vmax.f32 %v509_v13, 0.0  ;;  %v514_v21 = vadd.f32 %v988_v38, %v1005_v8 }
  0xe8   : > { %632 = vmatpush.msrb.mxu1 %v606_v39 }
  0xe9   : > { %v570_v33 = vadd.f32 %v569_v26, %v538_v24  ;;  %v517_v24 = vadd.f32 %v988_v38, %v1013_v27  ;;  %v522_v27 = vadd.f32 %v988_v38, %v521_v12 }
  0xea   : > { %633 = vmatpush.msrb.mxu1 %v605_v23 }
  0xeb   : > { %v571_v41 = vadd.f32 %v570_v33, %v539_v31  ;;  %v553_v31 = vmax.f32 %v514_v21, 0.0  ;;  %v519_v33 = vadd.f32 %v988_v38, %v518_v55  ;;  %v554_v40 = vmax.f32 %v517_v24, 0.0 }
  0xec   : > { %634 = vmatpush.msrb.mxu1 %v604_v29 }
  0xed   : > { %v572_v44 = vadd.f32 %v571_v41, %v540_v37  ;;  %v523_v37 = vpop.f32.mrf.mxu3  ;;  %v555_v25 = vmax.f32 %v519_v33, 0.0 }
  0xee   : > { %635 = vmatpush.msrb.mxu1 %v603_v35 }
  0xef   : > { %v573_v49 = vadd.f32 %v572_v44, %v541_v43  ;;  %v524_v43 = vadd.f32 %v988_v38, %v523_v37  ;;  %v556_v44 = vmax.f32 %v522_v27, 0.0  ;;  %v619_v38 = vld [vmem:[%s1111_s4] sm:$0x1] }
  0xf1   : > { %v574_v52 = vadd.f32 %v573_v49, %v542_v30  ;;  %v557_v47 = vmax.f32 %v524_v43, 0.0 }
  0xf3   : > { %v575_v57 = vadd.f32 %v574_v52, %v543_v51  ;;  %v558_v52 = vld [vmem:[#allocation2] sm:$0x1] }
  0xf5   : > { %v576_v45 = vadd.f32 %v575_v57, %v544_v56 }
  0xf7   : > { %v577_v1 = vadd.f32 %v576_v45, %v545_v59 }
  0xf9   : > { %v578_v4 = vadd.f32 %v577_v1, %v546_v0 }
  0xfb   : > { %v579_v9 = vadd.f32 %v578_v4, %v547_v3 }
  0xfd   : > { %v580_v14 = vadd.f32 %v579_v9, %v548_v10 }
  0xff   : > { %v581_v18 = vadd.f32 %v580_v14, %v549_v15 }
 0x101   : > { %v582_v22 = vadd.f32 %v581_v18, %v550_v17 }
 0x103   : > { %v583_v26 = vadd.f32 %v582_v22, %v551_v20 }
 0x105   : > { %v584_v8 = vadd.f32 %v583_v26, %v552_v54 }
 0x107   : > { %v585_v41 = vadd.f32 %v584_v8, %v553_v31 }
 0x109   : > { %v586_v42 = vadd.f32 %v585_v41, %v554_v40 }
 0x10b   : > { %v587_v28 = vadd.f32 %v586_v42, %v555_v25 }
 0x10d   : > { %v588_v46 = vadd.f32 %v587_v28, %v556_v44 }
 0x10f   : > { %v589_v30 = vadd.f32 %v588_v46, %v557_v47 }
 0x111   : > { %v590_v48 = vrot.slane %v589_v30, 4 }
 0x113   : > { %v591_v49 = vadd.f32 %v590_v48, %v589_v30 }
 0x115   : > { %v592_v50 = vrot.slane %v591_v49, 2 }
 0x117   : > { %v593_v51 = vadd.f32 %v592_v50, %v591_v49 }
 0x119   : > { %v594_v32 = vrot.slane %v593_v51, 1 }
 0x11b   : > { %v595_v53 = vadd.f32 %v594_v32, %v593_v51 }
 0x11d   : > { %v596_v55 = vadd.f32 %v595_v53, %v558_v52 }
 0x11f   : > { %597 = vst [vmem:[#allocation2] sm:$0x1] %v596_v55 }
 0x126   : > { %v601_v56 = vld [vmem:[#allocation2] sm:$0x1] }
 0x127   : > { %v602_v36 = vmul.f32 0.00390625, %v601_v56 }
 0x129   : > { %636 = vmatmul.f32.vlgmr.msrb.gmra.mxu1 %v602_v36 }
 0x1a6   : > { %v637_v57 = vpop.f32.mrf.mxu1 }
 0x1a7   : > { %v638_v58 = vadd.f32 %v637_v57, %v619_v38 }
 0x1a9   : > { %v640_v59 = vperm.slane %v638_v58, 0 }
 0x1ab   : > { %641 = vst [vmem:[%s243_s30] sm:$0xff] %v640_v59 }
 0x1ac PF: > { %s15_s20 = sadd.s32 1, %s874_s20   ;;  %s1113_s18 = smov %s870_s19 }
 0x1ad   : > { %p12_p6 = scmp.ge.s32.totalorder %s15_s20, 4   ;;  %s1114_s19 = smov %s1116_s21 }
 0x1af   :  { %14 = sbr.rel (!%p12_p6) target bundleno = 2 (0x2), region = 78 }

</bundles_post_ra>
